<compile_context>
chip_gen: v6e
topology: v6e:2x2x1
jax: 0.10.0
libtpu: 0.0.40
codegen_flags: <defaults>
</compile_context>

<pallas_src>
import functools

import jax
import jax.numpy as jnp
from jax.experimental import pallas as pl
from jax.experimental.pallas import tpu as pltpu

_LANES = 128
_MAX_BLOCK_ROWS = 4096          # (4096, 128) f32 block = 2 MiB per buffer
_PALLAS_MIN_ELEMENTS = 262144   # below ~256K elems, fused XLA is already at roofline


def _cdiv(a, b):
    return -(-a // b)


def _round_up(a, b):
    return _cdiv(a, b) * b


# --------------------------------------------------------------------------- #
# Kernel: per-core partial sum of squared differences.
# --------------------------------------------------------------------------- #
def _sumsq_partial_kernel(yhat_ref, y_ref, out_ref, acc_ref, *,
                          tm, rows_valid, steps_per_core, need_mask):
    c = pl.program_id(0)   # core-split axis   ("parallel")
    s = pl.program_id(1)   # streaming axis    ("arbitrary")

    @pl.when(s == 0)
    def _init():
        acc_ref[...] = jnp.zeros_like(acc_ref)

    # Cast in-register (after DMA) so bf16 inputs move half the HBM bytes.
    d = yhat_ref[...].astype(jnp.float32) - y_ref[...].astype(jnp.float32)
    d2 = d * d

    if need_mask:
        # Ragged trailing block: rows at or past `rows_valid` were never written
        # by the DMA (undefined, possibly NaN/Inf) -> discard with a select,
        # never with a 0/1 multiply.
        row0 = (c * steps_per_core + s) * tm
        rows_left = rows_valid - row0
        row_ids = jax.lax.broadcasted_iota(jnp.int32, d2.shape, 0)
        d2 = jnp.where(row_ids < rows_left, d2, 0.0)

    # Full-vreg (8,128) bank of partials: per-step work is pure VALU adds; the
    # single cross-sublane/lane reduce is deferred to the wrapper epilogue.
    acc_ref[...] += jnp.sum(d2.reshape(-1, 8, _LANES), axis=0)

    @pl.when(s == steps_per_core - 1)
    def _finalize():
        out_ref[...] = acc_ref[...].reshape(out_ref.shape)


# --------------------------------------------------------------------------- #
# Pallas driver: RMSE of two length-n flat vectors.
# --------------------------------------------------------------------------- #
def _rmse_pallas(flat_yhat, flat_y, n):
    # View the flat vector as a lane-dense (rows, 128) slab.  This reshape is
    # free when n is a multiple of 128; otherwise a single <=127-element zero
    # pad is unavoidable (padded diffs are 0, so the sum stays unbiased).
    target = max(_round_up(n, _LANES), 8 * _LANES)
    pad = target - n
    if pad:
        flat_yhat = jnp.pad(flat_yhat, (0, pad))
        flat_y = jnp.pad(flat_y, (0, pad))
    rows_arr = target // _LANES

    yh2 = flat_yhat.reshape(rows_arr, _LANES)
    y2 = flat_y.reshape(rows_arr, _LANES)

    # Row-block size: as large as possible (up to 2 MiB f32), multiple of 32.
    if rows_arr >= _MAX_BLOCK_ROWS:
        tm = _MAX_BLOCK_ROWS
    elif rows_arr >= 32:
        tm = (rows_arr // 32) * 32
    else:
        tm = (rows_arr // 8) * 8            # rows_arr >= 8 guaranteed by `target`

    total_blocks = _cdiv(rows_arr, tm)
    # Two-way split across TensorCores (v7x); on 1-TC chips it is just a loop.
    n_split = 2 if (total_blocks >= 2 and total_blocks % 2 == 0) else 1
    steps = total_blocks // n_split
    need_mask = (rows_arr % tm) != 0

    kernel = functools.partial(
        _sumsq_partial_kernel,
        tm=tm, rows_valid=rows_arr, steps_per_core=steps, need_mask=need_mask)

    partials = pl.pallas_call(
        kernel,
        out_shape=jax.ShapeDtypeStruct((n_split, 8, _LANES), jnp.float32),
        grid_spec=pltpu.PrefetchScalarGridSpec(
            num_scalar_prefetch=0,
            grid=(n_split, steps),
            in_specs=[
                pl.BlockSpec((tm, _LANES), lambda c, s: (c * steps + s, 0)),
                pl.BlockSpec((tm, _LANES), lambda c, s: (c * steps + s, 0)),
            ],
            out_specs=pl.BlockSpec((1, 8, _LANES), lambda c, s: (c, 0, 0)),
            scratch_shapes=[pltpu.VMEM((8, _LANES), jnp.float32)],
        ),
        compiler_params=pltpu.CompilerParams(
            dimension_semantics=("parallel", "arbitrary"),
        ),
    )(yh2, y2)

    # Tiny epilogue: combine per-core lane partials, divide by the TRUE n, sqrt.
    return jnp.sqrt(jnp.sum(partials) / float(n))


# --------------------------------------------------------------------------- #
# PyTorch glue: first batch_size elements of transpose(0,1).reshape(-1),
# without materializing a transpose of the whole tensor.
# --------------------------------------------------------------------------- #
def _column_major_prefix(yhat, batch_size):
    if yhat.ndim <= 1:
        return yhat.reshape(-1)[:batch_size]
    if yhat.ndim == 2 and (yhat.shape[0] == 1 or yhat.shape[1] == 1):
        # (B,1)/(1,B): transpose(0,1)+flatten is just a flatten — no copy.
        return yhat.reshape(-1)[:batch_size]
    # transpose(0,1)+flatten orders elements by (i1, i0, i2, ...); the first
    # batch_size of them only touch the first `ncols` slabs along axis 1.
    d1 = yhat.shape[1]
    rest = 1
    for i, d in enumerate(yhat.shape):
        if i != 1:
            rest *= d
    ncols = min(d1, _cdiv(batch_size, max(rest, 1)))
    sub = jax.lax.slice_in_dim(yhat, 0, ncols, axis=1)
    perm = (1, 0) + tuple(range(2, yhat.ndim))
    return jnp.transpose(sub, perm).reshape(-1)[:batch_size]


def rmse_loss(yhat, y, batch_size, use_pallas=None):
    """Pallas implementation of RMSELoss.forward(yhat, y)."""
    flat = _column_major_prefix(yhat, batch_size)
    flat_y = y.reshape(-1)

    if flat.shape[0] != flat_y.shape[0]:
        raise ValueError(
            f"yhat prefix has {flat.shape[0]} elements but y has "
            f"{flat_y.shape[0]}; MSELoss requires matching sizes.")
    n = int(flat.shape[0])

    if use_pallas is None:
        use_pallas = n >= _PALLAS_MIN_ELEMENTS

    if not use_pallas:
        # Small case: one fused XLA sub/square/mean/sqrt beats any hand kernel.
        d = flat.astype(jnp.float32) - flat_y.astype(jnp.float32)
        return jnp.sqrt(jnp.mean(d * d))

    return _rmse_pallas(flat, flat_y, n)


def _reference(yhat, y, batch_size):
    if yhat.ndim >= 2:
        perm = (1, 0) + tuple(range(2, yhat.ndim))
        flat = jnp.transpose(yhat, perm).reshape(-1)[:batch_size]
    else:
        flat = yhat.reshape(-1)[:batch_size]
    d = flat.astype(jnp.float32) - y.reshape(-1).astype(jnp.float32)
    return jnp.sqrt(jnp.mean(d * d))


if __name__ == "__main__":
    key = jax.random.PRNGKey(0)
    keys = jax.random.split(key, 10)

    # Case A: (B,1) discriminator output, n multiple of 128 -> zero-copy glue,
    # no pad, single block.
    bs = 8192
    yhat = jax.random.normal(keys[0], (bs, 1), dtype=jnp.float32)
    y = jax.random.normal(keys[1], (bs,), dtype=jnp.float32)
    loss = rmse_loss(yhat, y, bs, use_pallas=True)
    jax.block_until_ready(loss)
    ref = _reference(yhat, y, bs)
    assert jnp.allclose(loss, ref, rtol=1e-4, atol=1e-5), (loss, ref)

    # Case B: (B,3) input, n not a multiple of 128 -> column-slice glue,
    # 128-pad, in-kernel ragged-row mask, 2-way core split (2 blocks).
    bsB = 10000
    yhatB = jax.random.normal(keys[2], (bsB, 3), dtype=jnp.float32)
    yB = jax.random.normal(keys[3], (bsB,), dtype=jnp.float32)
    lossB = rmse_loss(yhatB, yB, bsB, use_pallas=True)
    jax.block_until_ready(lossB)
    refB = _reference(yhatB, yB, bsB)
    assert jnp.allclose(lossB, refB, rtol=1e-4, atol=1e-5), (lossB, refB)

    # Case C: batch_size spans several columns of a (128,4) tensor — exercises
    # the multi-column slice glue (only 3 of 4 columns are touched).
    bsC = 300
    yhatC = jax.random.normal(keys[4], (128, 4), dtype=jnp.float32)
    yC = jax.random.normal(keys[5], (bsC,), dtype=jnp.float32)
    lossC = rmse_loss(yhatC, yC, bsC, use_pallas=True)
    jax.block_until_ready(lossC)
    refC = _reference(yhatC, yC, bsC)
    assert jnp.allclose(lossC, refC, rtol=1e-4, atol=1e-5), (lossC, refC)

    # Case D: bf16 inputs — native-dtype DMA, in-kernel f32 cast.
    bsD = 4096
    yhatD = jax.random.normal(keys[6], (bsD, 1), dtype=jnp.bfloat16)
    yD = jax.random.normal(keys[7], (bsD,), dtype=jnp.bfloat16)
    lossD = rmse_loss(yhatD, yD, bsD, use_pallas=True)
    jax.block_until_ready(lossD)
    refD = _reference(yhatD, yD, bsD)
    assert jnp.allclose(lossD, refD, rtol=1e-3, atol=1e-4), (lossD, refD)

    # Case E: tiny default GAN batch — Pallas skipped (overhead-dominated).
    bsE = 8
    yhatE = jax.random.normal(keys[8], (bsE, 1), dtype=jnp.float32)
    yE = jax.random.normal(keys[9], (bsE,), dtype=jnp.float32)
    lossE = rmse_loss(yhatE, yE, bsE)
    jax.block_until_ready(lossE)
    refE = _reference(yhatE, yE, bsE)
    assert jnp.allclose(lossE, refE, rtol=1e-5, atol=1e-6), (lossE, refE)

    print("KERNEL_OK")
</pallas_src>

<mosaic_0001>
module attributes {stable_mosaic.version = 11 : i64} {
  func.func @_sumsq_partial_kernel(%arg0: i32, %arg1: i32, %arg2: memref<64x128xf32, #tpu.memory_space<vmem>>, %arg3: memref<64x128xf32, #tpu.memory_space<vmem>>, %arg4: memref<1x8x128xf32, #tpu.memory_space<vmem>>, %arg5: memref<8x128xf32, #tpu.memory_space<vmem>>) attributes {dimension_semantics = [#tpu.dimension_semantics<parallel>, #tpu.dimension_semantics<arbitrary>], iteration_bounds = array<i64: 1, 1>, scalar_prefetch = 0 : i64, scratch_operands = 1 : i64, tpu.core_type = #tpu.core_type<tc>, window_params = [{transform_indices = @transform_0, window_bounds = array<i64: 64, 128>}, {transform_indices = @transform_1, window_bounds = array<i64: 64, 128>}, {transform_indices = @transform_2, window_bounds = array<i64: 1, 8, 128>}]} {
    %c0_i32 = arith.constant 0 : i32
    %0 = arith.cmpi eq, %arg1, %c0_i32 : i32
    %1 = arith.extui %0 : i1 to i32
    %c0_i32_0 = arith.constant 0 : i32
    %2 = arith.cmpi ne, %1, %c0_i32_0 : i32
    scf.if %2 {
      %cst_10 = arith.constant 0.000000e+00 : f32
      %15 = vector.broadcast %cst_10 : f32 to vector<8x128xf32>
      %c0_11 = arith.constant 0 : index
      %c0_12 = arith.constant 0 : index
      %16 = vector.load %arg5[%c0_11, %c0_12] : memref<8x128xf32, #tpu.memory_space<vmem>>, vector<8x128xf32>
      tpu.vector_store %arg5[%c0_11, %c0_12], %15 {strides = array<i32>} : memref<8x128xf32, #tpu.memory_space<vmem>>, vector<8x128xf32>,
    } else {
    }
    %c0 = arith.constant 0 : index
    %c0_1 = arith.constant 0 : index
    %3 = vector.load %arg2[%c0, %c0_1] : memref<64x128xf32, #tpu.memory_space<vmem>>, vector<64x128xf32>
    %c0_2 = arith.constant 0 : index
    %c0_3 = arith.constant 0 : index
    %4 = vector.load %arg3[%c0_2, %c0_3] : memref<64x128xf32, #tpu.memory_space<vmem>>, vector<64x128xf32>
    %5 = arith.subf %3, %4 : vector<64x128xf32>
    %6 = arith.mulf %5, %5 : vector<64x128xf32>
    %c0_4 = arith.constant 0 : index
    %c0_5 = arith.constant 0 : index
    %7 = vector.load %arg5[%c0_4, %c0_5] : memref<8x128xf32, #tpu.memory_space<vmem>>, vector<8x128xf32>
    %8 = vector.shape_cast %6 : vector<64x128xf32> to vector<8x8x128xf32>
    %cst = arith.constant dense<0.000000e+00> : vector<8x128xf32>
    %9 = vector.multi_reduction <add>, %8, %cst [0] : vector<8x8x128xf32> to vector<8x128xf32>
    %10 = arith.addf %7, %9 : vector<8x128xf32>
    %c0_6 = arith.constant 0 : index
    %c0_7 = arith.constant 0 : index
    %11 = vector.load %arg5[%c0_6, %c0_7] : memref<8x128xf32, #tpu.memory_space<vmem>>, vector<8x128xf32>
    tpu.vector_store %arg5[%c0_6, %c0_7], %10 {strides = array<i32>} : memref<8x128xf32, #tpu.memory_space<vmem>>, vector<8x128xf32>,
    %c0_i32_8 = arith.constant 0 : i32
    %12 = arith.cmpi eq, %arg1, %c0_i32_8 : i32
    %13 = arith.extui %12 : i1 to i32
    %c0_i32_9 = arith.constant 0 : i32
    %14 = arith.cmpi ne, %13, %c0_i32_9 : i32
    scf.if %14 {
      %c0_10 = arith.constant 0 : index
      %c0_11 = arith.constant 0 : index
      %15 = vector.load %arg5[%c0_10, %c0_11] : memref<8x128xf32, #tpu.memory_space<vmem>>, vector<8x128xf32>
      %16 = vector.shape_cast %15 : vector<8x128xf32> to vector<1x8x128xf32>
      %c0_12 = arith.constant 0 : index
      %c0_13 = arith.constant 0 : index
      %c0_14 = arith.constant 0 : index
      %17 = vector.load %arg4[%c0_12, %c0_13, %c0_14] : memref<1x8x128xf32, #tpu.memory_space<vmem>>, vector<1x8x128xf32>
      tpu.vector_store %arg4[%c0_12, %c0_13, %c0_14], %16 {strides = array<i32>} : memref<1x8x128xf32, #tpu.memory_space<vmem>>, vector<1x8x128xf32>,
    } else {
    }
    return
  }
  func.func @transform_0(%arg0: i32, %arg1: i32) -> (i32, i32) {
    %c1_i32 = arith.constant 1 : i32
    %0 = arith.muli %arg0, %c1_i32 : i32
    %1 = arith.addi %0, %arg1 : i32
    %c0_i32 = arith.constant 0 : i32
    %c0_i32_0 = arith.constant 0 : i32
    return %1, %c0_i32 : i32, i32
  }
  func.func @transform_1(%arg0: i32, %arg1: i32) -> (i32, i32) {
    %c1_i32 = arith.constant 1 : i32
    %0 = arith.muli %arg0, %c1_i32 : i32
    %1 = arith.addi %0, %arg1 : i32
    %c0_i32 = arith.constant 0 : i32
    %c0_i32_0 = arith.constant 0 : i32
    return %1, %c0_i32 : i32, i32
  }
  func.func @transform_2(%arg0: i32, %arg1: i32) -> (i32, i32, i32) {
    %c0_i32 = arith.constant 0 : i32
    %c0_i32_0 = arith.constant 0 : i32
    %c0_i32_1 = arith.constant 0 : i32
    return %arg0, %c0_i32, %c0_i32_0 : i32, i32, i32
  }
}

</mosaic_0001>

<bundles_post_ra>
// kernel: tpu_custom_call.1
= control target key start
LH: loop header
LB: loop body
LE: loop exit
PB: predicated region body
PF: predicated region fallthrough
CT: control target
= control target key end

     0   :  { %7 = vsyncpa [#allocation4], 0  ;;  %s220_s0 = inlined_call_operand.hbm [shape: f32[64,128], index: 0, kind: input, shape index: {}]   ;;  %s221_s1 = inlined_call_operand.hbm [shape: f32[64,128], index: 1, kind: input, shape index: {}]   ;;  %s222_s2 = inlined_call_operand.hbm [shape: f32[1,8,128], index: 2, kind: output, shape index: {}]  }
   0x1   :  { %8 = vsyncpa [#allocation7], 0 }
   0x2   :  { %9 = vsyncpa [#allocation5], 0  ;;  %s191_s9 = smov [#allocation3]  }
   0x3   :  { %s19_s10 = sshll.u32 %s191_s9, 4  ;;  %s20_s10 = int_to_ptr.vmem [resolvable:$true] %s19_s10 }
   0x4   :  { %s133_s11 = scalar_lea.vmem %s20_s10, 1024  ;;  %p138_p1 = scmp.lt.s32.totalorder %s20_s10, %s20_s10 }
   0x5   :  { %p134_p0 = scmp.ne.s32.totalorder %s20_s10, %s133_s11  ;;  %p139_p2 = scmp.lt.s32.totalorder %s133_s11, %s133_s11 }
   0x7   :  { %p140_p3 = por %p139_p2, %p138_p1 }
   0x9   :  { %p141_p4 = pnand %p140_p3, %p134_p0 }
   0xb   :  { %144 = shalt.err (!%p141_p4)
}
   0xc   :  { %s192_s12 = smov 128   ;;  %s193_s13 = smov 8  }
   0xd   :  { %25 = dma.hbm_to_vmem [thread:$0]  %s220_s0, 1024, %s20_s10, [#allocation4], %s192_s12, %s192_s12, %s193_s13  }
   0xe   :  { %s194_s16 = smov [#allocation6]  }
   0xf   :  { %s35_s17 = sshll.u32 %s194_s16, 4  ;;  %s36_s17 = int_to_ptr.vmem [resolvable:$true] %s35_s17 }
  0x10   :  { %s153_s18 = scalar_lea.vmem %s36_s17, 1024  ;;  %p158_p6 = scmp.lt.s32.totalorder %s36_s17, %s36_s17 }
  0x11   :  { %p154_p5 = scmp.ne.s32.totalorder %s36_s17, %s153_s18  ;;  %p159_p7 = scmp.lt.s32.totalorder %s153_s18, %s153_s18 }
  0x13   :  { %p160_p8 = por %p159_p7, %p158_p6 }
  0x15   :  { %p161_p9 = pnand %p160_p8, %p154_p5 }
  0x17   :  { %164 = shalt.err (!%p161_p9)
}
  0x18   :  { %41 = dma.hbm_to_vmem [thread:$0]  %s221_s1, 1024, %s36_s17, [#allocation7], %s192_s12, %s192_s12, %s193_s13  }
  0x19   :  { %185 = dma.done.wait [#allocation4], 1024  }
  0x1a   :  { %186 = vsyncadd [#allocation4], 4294966272 }
  0x1b   :  { %187 = dma.done.wait [#allocation7], 1024  }
  0x1c   :  { %188 = vsyncadd [#allocation7], 4294966272  ;;  %v57_v0 = vld [vmem:[#allocation3] sm:$0xff]  ;;  %v58_v1 = vld [vmem:[#allocation3 + $0x8] sm:$0xff]  ;;  %s195_s0 = smov [#allocation8]  }
  0x1d   :  { %v59_v2 = vld [vmem:[#allocation3 + $0x10] sm:$0xff]  ;;  %v60_v3 = vld [vmem:[#allocation3 + $0x18] sm:$0xff]  ;;  %v61_v4 = vld [vmem:[#allocation3 + $0x20] sm:$0xff]  ;;  %s110_s1 = sshll.u32 %s195_s0, 4  ;;  %s111_s1 = int_to_ptr.vmem [resolvable:$true] %s110_s1 }
  0x1e   :  { %v65_v5 = vld [vmem:[#allocation6] sm:$0xff]  ;;  %v66_v6 = vld [vmem:[#allocation6 + $0x8] sm:$0xff]  ;;  %v67_v7 = vld [vmem:[#allocation6 + $0x10] sm:$0xff]  ;;  %s165_s21 = scalar_lea.vmem %s111_s1, 128  ;;  %p170_p11 = scmp.lt.s32.totalorder %s111_s1, %s111_s1 }
  0x1f   :  { %v68_v8 = vld [vmem:[#allocation6 + $0x18] sm:$0xff]  ;;  %v73_v9 = vsub.f32 %v57_v0, %v65_v5  ;;  %v69_v10 = vld [vmem:[#allocation6 + $0x20] sm:$0xff]  ;;  %v74_v11 = vsub.f32 %v58_v1, %v66_v6  ;;  %v75_v12 = vsub.f32 %v59_v2, %v67_v7  ;;  %v62_v14 = vld [vmem:[#allocation3 + $0x28] sm:$0xff]  ;;  %p166_p10 = scmp.ne.s32.totalorder %s111_s1, %s165_s21  ;;  %p171_p12 = scmp.lt.s32.totalorder %s165_s21, %s165_s21 }
  0x20   :  { %v76_v13 = vsub.f32 %v60_v3, %v68_v8  ;;  %v70_v15 = vld [vmem:[#allocation6 + $0x28] sm:$0xff]  ;;  %v77_v17 = vsub.f32 %v61_v4, %v69_v10  ;;  %v63_v20 = vld [vmem:[#allocation3 + $0x30] sm:$0xff]  ;;  %v64_v25 = vld [vmem:[#allocation3 + $0x38] sm:$0xff] }
  0x21   :  { %v81_v16 = vmul.f32 %v73_v9, %v73_v9  ;;  %v82_v18 = vmul.f32 %v74_v11, %v74_v11  ;;  %v83_v19 = vmul.f32 %v75_v12, %v75_v12  ;;  %v71_v21 = vld [vmem:[#allocation6 + $0x30] sm:$0xff]  ;;  %v78_v22 = vsub.f32 %v62_v14, %v70_v15  ;;  %v72_v26 = vld [vmem:[#allocation6 + $0x38] sm:$0xff]  ;;  %p172_p13 = por %p171_p12, %p170_p11 }
  0x22   :  { %v84_v23 = vmul.f32 %v76_v13, %v76_v13  ;;  %v79_v27 = vsub.f32 %v63_v20, %v71_v21  ;;  %v85_v28 = vmul.f32 %v77_v17, %v77_v17  ;;  %v80_v30 = vsub.f32 %v64_v25, %v72_v26 }
  0x23   :  { %v90_v24 = vadd.f32 %v82_v18, %v81_v16  ;;  %v86_v31 = vmul.f32 %v78_v22, %v78_v22  ;;  %p173_p0 = pnand %p172_p13, %p166_p10 }
  0x24   :  { %v87_v33 = vmul.f32 %v79_v27, %v79_v27  ;;  %v88_v35 = vmul.f32 %v80_v30, %v80_v30 }
  0x25   :  { %v91_v29 = vadd.f32 %v90_v24, %v83_v19 }
  0x27   :  { %v92_v32 = vadd.f32 %v91_v29, %v84_v23 }
  0x29   :  { %v93_v34 = vadd.f32 %v92_v32, %v85_v28 }
  0x2b   :  { %v94_v36 = vadd.f32 %v93_v34, %v86_v31 }
  0x2d   :  { %v95_v37 = vadd.f32 %v94_v36, %v87_v33 }
  0x2f   :  { %v96_v38 = vadd.f32 %v95_v37, %v88_v35 }
  0x31   :  { %103 = vst [vmem:[#allocation8] sm:$0xff] %v96_v38 }
  0x32   :  { %176 = shalt.err (!%p173_p0)
}
  0x33   :  { %113 = dma.vmem_to_hbm [thread:$0]  %s111_s1, 128, %s222_s2, [#allocation5]  }
  0x34   :  { %189 = dma.done.wait [#allocation5], 128  }
  0x35   :  { %190 = vsyncadd [#allocation5], 4294967168 }
  0x36   :  { %117 = vsyncpa [#allocation4], 1 }
  0x37   :  { %118 = vsyncpa [#allocation7], 1 }
  0x38   :  { %119 = vsyncpa [#allocation5], 1 }

</bundles_post_ra>
